<compile_context>
chip_gen: v7x
topology: tpu7x:2x2x1
jax: 0.10.0
libtpu: 0.0.40
codegen_flags: <defaults>
</compile_context>

<pallas_src>
import math

import jax
import jax.numpy as jnp
from jax.experimental import pallas as pl
from jax.experimental.pallas import tpu as pltpu

_LOG_SQRT_2PI = 0.5 * math.log(2.0 * math.pi)


# ---------------------------------------------------------------------------
# Kernels.  forward() (mean = obs, scale = |obs| + 0.5 stand-in for the
# abstract base) is fused, so each kernel reads only `obs` plus one other
# array -> minimal HBM traffic for these memory-bound elementwise ops.
# ---------------------------------------------------------------------------
def _log_prob_kernel(obs_ref, act_ref, out_ref):
    obs = obs_ref[...].astype(jnp.float32)
    act = act_ref[...].astype(jnp.float32)
    mean = obs
    scale = jnp.abs(obs) + jnp.float32(0.5)
    z = (act - mean) / scale                      # exact divide (see header)
    lp = -0.5 * z * z - jnp.log(scale) - jnp.float32(_LOG_SQRT_2PI)
    out_ref[...] = lp.astype(out_ref.dtype)


def _sample_kernel(obs_ref, noise_ref, out_ref):
    obs = obs_ref[...].astype(jnp.float32)
    noise = noise_ref[...].astype(jnp.float32)
    scale = jnp.abs(obs) + jnp.float32(0.5)
    out_ref[...] = (obs + scale * noise).astype(out_ref.dtype)


# ---------------------------------------------------------------------------
# Layout: flatten to a lane-dense (rows, lanes) slab, lanes in {512,256,128}.
# ---------------------------------------------------------------------------
_TARGET_BLOCK_ELEMS = 256 * 1024      # ~1 MiB of f32 per operand per block


def _layout(total):
    """Pick (rows, lanes, pad) so total+pad == rows*lanes, lanes % 128 == 0."""
    for lanes in (512, 256, 128):
        if total % lanes == 0:
            return total // lanes, lanes, 0
    lanes = 128                        # rare path: trailing pad to one lane row
    pad = (-total) % lanes
    return (total + pad) // lanes, lanes, pad


def _choose_block_rows(rows, lanes):
    """~1 MiB blocks, multiple of 8; >=2 grid steps when possible (v7x)."""
    block_rows = max(8, _TARGET_BLOCK_ELEMS // lanes)
    if rows > 8:
        half = -(-rows // 2)           # cdiv(rows, 2)
        half = -(-half // 8) * 8       # round up to a multiple of 8
        block_rows = min(block_rows, half)
    if block_rows >= rows:
        block_rows = rows              # single full-dim block (always legal)
    return block_rows


def _run_elementwise(kernel, *arrays):
    """Run a fused elementwise kernel over same-shaped arrays."""
    orig_shape = arrays[0].shape
    out_dtype = jnp.result_type(*arrays)
    total = arrays[0].size
    rows, lanes, pad = _layout(total)

    def to_slab(a):
        flat = a.reshape(-1)
        if pad:
            flat = jnp.pad(flat, (0, pad))       # only when total % 128 != 0
        return flat.reshape(rows, lanes)

    slabs = [to_slab(a) for a in arrays]

    block_rows = _choose_block_rows(rows, lanes)
    grid = (pl.cdiv(rows, block_rows),)          # edge block masked by Pallas
    spec = pl.BlockSpec((block_rows, lanes), lambda i: (i, 0))

    out = pl.pallas_call(
        kernel,
        out_shape=jax.ShapeDtypeStruct((rows, lanes), out_dtype),
        grid_spec=pltpu.PrefetchScalarGridSpec(
            num_scalar_prefetch=0,
            grid=grid,
            in_specs=[spec] * len(slabs),
            out_specs=spec,
        ),
        compiler_params=pltpu.CompilerParams(
            dimension_semantics=("parallel",)),   # lets v7x split across 2 TCs
    )(*slabs)

    out = out.reshape(-1)
    if pad:
        out = out[:total]
    return out.reshape(orig_shape)


@jax.jit
def pallas_log_prob(observations, actions):
    return _run_elementwise(_log_prob_kernel, observations, actions)


@jax.jit
def pallas_sample(observations, noise):
    return _run_elementwise(_sample_kernel, observations, noise)


# ---------------------------------------------------------------------------
# Module analogue
# ---------------------------------------------------------------------------
class BaseContinuousModelPallas:
    """Pallas-backed analogue of BaseContinuousModel (no parameters)."""

    def forward(self, inputs):
        # TODO(synk): BaseContinuousModel.forward raises AssertionError
        # (abstract base); a deterministic stand-in (mean = obs,
        # scale = |obs| + 0.5) is used so the Normal kernels have parameters.
        # The same formula is fused inside the kernels.
        mean = inputs
        scale = jnp.abs(inputs) + jnp.float32(0.5)
        return mean, scale

    def sample(self, observation, key=None):
        # TODO(synk): on real-HW-only deployments, draw the noise in-kernel
        # (pltpu.prng_seed + pltpu.stateful_normal) to drop one HBM array;
        # host-side jax.random.normal is kept for interpret-mode portability.
        # TODO(synk): key=None reuses PRNGKey(0) -> deterministic; pass a
        # fresh key per call for genuinely stochastic sampling.
        if key is None:
            key = jax.random.PRNGKey(0)
        noise = jax.random.normal(key, observation.shape, dtype=jnp.float32)
        return pallas_sample(observation, noise)

    def log_prob(self, observations, actions):
        return pallas_log_prob(observations, actions)

    # identity (un)flatteners, as in the PyTorch base
    def flatten_observation(self, observation):
        return observation

    def flatten_action(self, action):
        return action

    def unflatten_observation(self, observation):
        return observation

    def unflatten_action(self, action):
        return action


# ---------------------------------------------------------------------------
# Demo / smoke test
# ---------------------------------------------------------------------------
if __name__ == "__main__":
    key = jax.random.PRNGKey(0)
    k_obs, k_act, k_noise = jax.random.split(key, 3)

    # NCHW observation, small shapes.
    obs = jax.random.normal(k_obs, (2, 4, 16, 16), dtype=jnp.float32)
    actions = jax.random.normal(k_act, (2, 4, 16, 16), dtype=jnp.float32)

    model = BaseContinuousModelPallas()

    lp = model.log_prob(obs, actions)
    smp = model.sample(obs, key=k_noise)
    jax.block_until_ready((lp, smp))

    # Reference checks (closed-form Normal logpdf; deterministic reparam sample).
    mean, scale = model.forward(obs)
    ref_lp = (-0.5 * ((actions - mean) / scale) ** 2
              - jnp.log(scale) - 0.5 * math.log(2.0 * math.pi))
    noise = jax.random.normal(k_noise, obs.shape, dtype=jnp.float32)
    ref_smp = mean + scale * noise

    assert lp.shape == obs.shape and smp.shape == obs.shape
    assert bool(jnp.all(jnp.isfinite(lp)))
    assert bool(jnp.all(jnp.isfinite(smp)))
    assert jnp.allclose(lp, ref_lp, atol=1e-4, rtol=1e-4)
    assert jnp.allclose(smp, ref_smp, atol=1e-4, rtol=1e-4)

    print("KERNEL_OK")
</pallas_src>

<mosaic_0001>
module attributes {stable_mosaic.version = 11 : i64} {
  func.func @_log_prob_kernel(%arg0: i32, %arg1: memref<4x512xf32, #tpu.memory_space<vmem>>, %arg2: memref<4x512xf32, #tpu.memory_space<vmem>>, %arg3: memref<4x512xf32, #tpu.memory_space<vmem>>) attributes {dimension_semantics = [#tpu.dimension_semantics<parallel>], iteration_bounds = array<i64: 1>, scalar_prefetch = 0 : i64, scratch_operands = 0 : i64, tpu.core_type = #tpu.core_type<tc>, window_params = [{transform_indices = @transform_0, window_bounds = array<i64: 4, 512>}, {transform_indices = @transform_1, window_bounds = array<i64: 4, 512>}, {transform_indices = @transform_2, window_bounds = array<i64: 4, 512>}]} {
    %c0 = arith.constant 0 : index
    %c0_0 = arith.constant 0 : index
    %0 = vector.load %arg1[%c0, %c0_0] : memref<4x512xf32, #tpu.memory_space<vmem>>, vector<4x512xf32>
    %c0_1 = arith.constant 0 : index
    %c0_2 = arith.constant 0 : index
    %1 = vector.load %arg2[%c0_1, %c0_2] : memref<4x512xf32, #tpu.memory_space<vmem>>, vector<4x512xf32>
    %2 = math.absf %0 : vector<4x512xf32>
    %cst = arith.constant 5.000000e-01 : f32
    %3 = vector.broadcast %cst : f32 to vector<4x512xf32>
    %4 = arith.addf %2, %3 : vector<4x512xf32>
    %5 = arith.subf %1, %0 : vector<4x512xf32>
    %6 = arith.divf %5, %4 : vector<4x512xf32>
    %cst_3 = arith.constant -5.000000e-01 : f32
    %7 = vector.broadcast %cst_3 : f32 to vector<4x512xf32>
    %8 = arith.mulf %7, %6 : vector<4x512xf32>
    %9 = arith.mulf %8, %6 : vector<4x512xf32>
    %10 = math.log %4 : vector<4x512xf32>
    %11 = arith.subf %9, %10 : vector<4x512xf32>
    %cst_4 = arith.constant 0.918938517 : f32
    %12 = vector.broadcast %cst_4 : f32 to vector<4x512xf32>
    %13 = arith.subf %11, %12 : vector<4x512xf32>
    %c0_5 = arith.constant 0 : index
    %c0_6 = arith.constant 0 : index
    %14 = vector.load %arg3[%c0_5, %c0_6] : memref<4x512xf32, #tpu.memory_space<vmem>>, vector<4x512xf32>
    tpu.vector_store %arg3[%c0_5, %c0_6], %13 {strides = array<i32>} : memref<4x512xf32, #tpu.memory_space<vmem>>, vector<4x512xf32>,
    return
  }
  func.func @transform_0(%arg0: i32) -> (i32, i32) {
    %c0_i32 = arith.constant 0 : i32
    %c0_i32_0 = arith.constant 0 : i32
    return %arg0, %c0_i32 : i32, i32
  }
  func.func @transform_1(%arg0: i32) -> (i32, i32) {
    %c0_i32 = arith.constant 0 : i32
    %c0_i32_0 = arith.constant 0 : i32
    return %arg0, %c0_i32 : i32, i32
  }
  func.func @transform_2(%arg0: i32) -> (i32, i32) {
    %c0_i32 = arith.constant 0 : i32
    %c0_i32_0 = arith.constant 0 : i32
    return %arg0, %c0_i32 : i32, i32
  }
}

</mosaic_0001>

<bundles_post_ra>
// kernel: pallas_log_prob.1
= control target key start
LH: loop header
LB: loop body
LE: loop exit
PB: predicated region body
PF: predicated region fallthrough
CT: control target
= control target key end

     0   :  { %s86_s0 = inlined_call_operand.vmem [shape: f32[4,512], index: 0, kind: input, shape index: {}]   ;;  %s87_s1 = inlined_call_operand.vmem [shape: f32[4,512], index: 1, kind: input, shape index: {}]   ;;  %s88_s2 = inlined_call_operand.vmem [shape: f32[4,512], index: 2, kind: output, shape index: {}]  }
   0x1   :  { %v11_v0 = vld [vmem:[%s86_s0] sm:$0xff]  ;;  %v12_v1 = vld [vmem:[%s86_s0 + $0x8] sm:$0xff] }
   0x2   :  { %v15_v2 = vand.u32 2147483647, %v11_v0  ;;  %v16_v3 = vand.u32 2147483647, %v12_v1  ;;  %v13_v6 = vld [vmem:[%s87_s1] sm:$0xff]  ;;  %v14_v7 = vld [vmem:[%s87_s1 + $0x8] sm:$0xff] }
   0x3   :  { %v19_v8 = vsub.f32 %v13_v6, %v11_v0  ;;  %v20_v9 = vsub.f32 %v14_v7, %v12_v1 }
   0x4   :  { %v17_v4 = vadd.f32 0.5, %v15_v2  ;;  %v18_v5 = vadd.f32 0.5, %v16_v3 }
   0x6   :  { %45 = vrcp.f32 %v17_v4 }
   0x7   :  { %47 = vlog2.f32 %v17_v4 }
   0x8   :  { %49 = vrcp.f32 %v18_v5 }
   0x9   :  { %51 = vlog2.f32 %v18_v5 }
  0x10   :  { %v46_v10 = vpop.eup %45 }
  0x11   :  { %v48_v11 = vpop.eup %47  ;;  %v22_v12 = vmul.f32 %v46_v10, %v19_v8 }
  0x12   :  { %v50_v13 = vpop.eup %49  ;;  %v30_v16 = vmul.f32 0.6931472, %v48_v11 }
  0x13   :  { %v52_v14 = vpop.eup %51  ;;  %v25_v15 = vmul.f32 -0.5, %v22_v12  ;;  %v24_v17 = vmul.f32 %v50_v13, %v20_v9 }
  0x14   :  { %v32_v20 = vmul.f32 0.6931472, %v52_v14 }
  0x15   :  { %v27_v18 = vmul.f32 %v25_v15, %v22_v12  ;;  %v26_v19 = vmul.f32 -0.5, %v24_v17 }
  0x17   :  { %v33_v21 = vsub.f32 %v27_v18, %v30_v16  ;;  %v28_v22 = vmul.f32 %v26_v19, %v24_v17 }
  0x19   :  { %v43_v23 = vadd.f32 -0.9189385, %v33_v21  ;;  %v34_v24 = vsub.f32 %v28_v22, %v32_v20 }
  0x1b   :  { %37 = vst [vmem:[%s88_s2] sm:$0xff] %v43_v23  ;;  %v44_v25 = vadd.f32 -0.9189385, %v34_v24 }
  0x1d   :  { %38 = vst [vmem:[%s88_s2 + $0x8] sm:$0xff] %v44_v25 }

</bundles_post_ra>
